<compile_context>
chip_gen: v7x
topology: tpu7x:2x2x1
jax: 0.10.0
libtpu: 0.0.40
codegen_flags: <defaults>
</compile_context>

<pallas_src>
import functools
import math

import jax
import jax.numpy as jnp
from jax.experimental import pallas as pl
from jax.experimental.pallas import tpu as pltpu


# ---------------------------------------------------------------------------
# Fused projection + multi-head attention kernel.
# One grid step = one batch element:
#   q/k/v projection (MXU) -> per-head scores/softmax/PV -> lane-dense store.
# ---------------------------------------------------------------------------
def _fused_mha_kernel(*refs, nh, dh, has_mask, shared_x):
    H = nh * dh
    i = 0
    if shared_x:
        x_ref = refs[i]; i += 1
        xq_ref = xk_ref = xv_ref = x_ref
    else:
        xq_ref, xk_ref, xv_ref = refs[i:i + 3]; i += 3
    w_ref, b_ref = refs[i:i + 2]; i += 2
    mbias_ref = None
    if has_mask:
        mbias_ref = refs[i]; i += 1
    o_ref = refs[i]

    cdt = xq_ref.dtype                       # native compute dtype (bf16/f32)
    w = w_ref[...]                           # (H, 3H); Wq pre-scaled by 1/sqrt(10)
    b = b_ref[...].astype(jnp.float32)       # (1, 3H)

    if shared_x:
        x = xq_ref[0]                                                  # (S, H)
        qkv = jnp.dot(x, w, preferred_element_type=jnp.float32) + b    # (S, 3H)
        qp, kp, vp = qkv[:, :H], qkv[:, H:2 * H], qkv[:, 2 * H:]
    else:
        qp = jnp.dot(xq_ref[0], w[:, :H],
                     preferred_element_type=jnp.float32) + b[:, :H]
        kp = jnp.dot(xk_ref[0], w[:, H:2 * H],
                     preferred_element_type=jnp.float32) + b[:, H:2 * H]
        vp = jnp.dot(xv_ref[0], w[:, 2 * H:],
                     preferred_element_type=jnp.float32) + b[:, 2 * H:]

    # Keep MXU operands in the native dtype (bf16-friendly); f32 accumulation.
    qp = qp.astype(cdt)
    kp = kp.astype(cdt)
    vp = vp.astype(cdt)

    mbias = mbias_ref[0] if has_mask else None   # (1, Sk) additive -1e9 bias

    outs = []
    for h in range(nh):                           # static unroll (nh is small)
        sl = slice(h * dh, (h + 1) * dh)
        q_h, k_h, v_h = qp[:, sl], kp[:, sl], vp[:, sl]
        # scores = q_h @ k_h^T (already scaled: scale folded into Wq/bq at init)
        s = jax.lax.dot_general(q_h, k_h, (((1,), (1,)), ((), ())),
                                preferred_element_type=jnp.float32)   # (Sq, Sk)
        if has_mask:
            s = s + mbias
        m = jnp.max(s, axis=-1, keepdims=True)
        p = jnp.exp(s - m)                        # unnormalized probs (f32)
        l = jnp.sum(p, axis=-1, keepdims=True)    # (Sq, 1)
        o_h = jnp.dot(p.astype(cdt), v_h,
                      preferred_element_type=jnp.float32)             # (Sq, dh)
        # deferred softmax normalization on the small (Sq, dh) result, EUP recip
        outs.append(o_h * pl.reciprocal(l, approx=True))

    # Concatenate heads in-kernel -> single lane-dense (Sq, H) store.
    o_ref[0] = jnp.concatenate(outs, axis=-1).astype(o_ref.dtype)


def fused_multi_head_attention(xq, xk, xv, W_qkv, b_qkv, mask=None, *,
                               head_num, dim_per_head):
    """xq: (B, Sq, H); xk/xv: (B, Sk, H); mask: (B, Sk) or None."""
    B, Sq, H = xq.shape
    Sk = xk.shape[1]
    assert xk.shape == (B, Sk, H) and xv.shape == (B, Sk, H)
    shared_x = (xq is xk) and (xk is xv)          # self-attention fast path
    has_mask = mask is not None

    kernel = functools.partial(_fused_mha_kernel, nh=head_num, dh=dim_per_head,
                               has_mask=has_mask, shared_x=shared_x)

    xq_spec = pl.BlockSpec((1, Sq, H), lambda bb: (bb, 0, 0))
    xkv_spec = pl.BlockSpec((1, Sk, H), lambda bb: (bb, 0, 0))
    # Weights / bias are grid-invariant (constant index_map -> fetched once).
    w_spec = pl.BlockSpec((H, 3 * H), lambda bb: (0, 0))
    b_spec = pl.BlockSpec((1, 3 * H), lambda bb: (0, 0))

    in_specs, args = [], []
    if shared_x:
        in_specs.append(xq_spec); args.append(xq)
    else:
        in_specs += [xq_spec, xkv_spec, xkv_spec]; args += [xq, xk, xv]
    in_specs += [w_spec, b_spec]; args += [W_qkv, b_qkv]
    if has_mask:
        mask_bias = jnp.where(mask == 0, jnp.float32(-1e9),
                              jnp.float32(0.0)).reshape(B, 1, Sk)
        in_specs.append(pl.BlockSpec((1, 1, Sk), lambda bb: (bb, 0, 0)))
        args.append(mask_bias)

    return pl.pallas_call(
        kernel,
        out_shape=jax.ShapeDtypeStruct((B, Sq, H), xq.dtype),
        grid=(B,),
        in_specs=in_specs,
        out_specs=pl.BlockSpec((1, Sq, H), lambda bb: (bb, 0, 0)),
        compiler_params=pltpu.CompilerParams(dimension_semantics=("parallel",)),
    )(*args)


# ---------------------------------------------------------------------------
# Module wrapper (parameters = Q/K/V Linear weights & biases).
# ---------------------------------------------------------------------------
class MultiHeadAttention:
    def __init__(self, hidden_dim, head_num=4, dropout=0.1, *,
                 param_key=None, dtype=jnp.float32):
        assert hidden_dim % head_num == 0
        self.hidden_dim = hidden_dim
        self.head_num = head_num
        self.dim_per_head = hidden_dim // head_num
        self.dropout = dropout  # defined (as in the spec) but never applied in forward

        if param_key is None:
            param_key = jax.random.PRNGKey(0)
        ks = jax.random.split(param_key, 6)
        lim = 1.0 / math.sqrt(hidden_dim)   # nn.Linear default init range
        u = lambda kk, shape: jax.random.uniform(kk, shape, dtype, minval=-lim, maxval=lim)
        self.Wq, self.bq = u(ks[0], (hidden_dim, hidden_dim)), u(ks[1], (hidden_dim,))
        self.Wk, self.bk = u(ks[2], (hidden_dim, hidden_dim)), u(ks[3], (hidden_dim,))
        self.Wv, self.bv = u(ks[4], (hidden_dim, hidden_dim)), u(ks[5], (hidden_dim,))

        # Fold the 1/sqrt(10) score scale into the Q projection once at init:
        #   ((x Wq + bq) @ (x Wk + bk)^T) / sqrt(10)
        #     == (x (Wq*s) + bq*s) @ (x Wk + bk)^T          with s = 1/sqrt(10)
        # and concatenate Wq|Wk|Wv into one (H, 3H) slab + (1, 3H) bias.
        s = jnp.asarray(1.0 / math.sqrt(10.0), dtype)
        self.W_qkv = jnp.concatenate([self.Wq * s, self.Wk, self.Wv], axis=1)
        self.b_qkv = jnp.concatenate([self.bq * s, self.bk, self.bv]
                                     ).reshape(1, 3 * hidden_dim)

    def __call__(self, q, k, v, mask=None):
        B, Sq, H = q.shape
        assert H == self.hidden_dim
        assert k.shape[0] == B and k.shape[2] == H and v.shape == k.shape
        return fused_multi_head_attention(
            q, k, v, self.W_qkv, self.b_qkv, mask,
            head_num=self.head_num, dim_per_head=self.dim_per_head)


# ---------------------------------------------------------------------------
# Plain-JAX reference for verification.
# ---------------------------------------------------------------------------
def reference_mha(mha, q, k, v, mask=None):
    qp = q @ mha.Wq + mha.bq
    kp = k @ mha.Wk + mha.bk
    vp = v @ mha.Wv + mha.bv
    B, Sq, H = qp.shape
    Sk = kp.shape[1]
    nh, dh = mha.head_num, mha.dim_per_head
    qh = qp.reshape(B, Sq, nh, dh).transpose(0, 2, 1, 3)
    kh = kp.reshape(B, Sk, nh, dh).transpose(0, 2, 1, 3)
    vh = vp.reshape(B, Sk, nh, dh).transpose(0, 2, 1, 3)
    s = jnp.einsum("bhqd,bhkd->bhqk", qh, kh) / math.sqrt(10.0)
    if mask is not None:
        s = jnp.where(mask[:, None, None, :] == 0, -1e9, s)
    p = jax.nn.softmax(s, axis=-1)
    o = jnp.einsum("bhqk,bhkd->bhqd", p, vh)
    return o.transpose(0, 2, 1, 3).reshape(B, Sq, H)


if __name__ == "__main__":
    key = jax.random.PRNGKey(0)
    k_x, k_k, k_v, k_par = jax.random.split(key, 4)

    batch, seq, hidden, heads = 2, 16, 128, 4
    x = jax.random.normal(k_x, (batch, seq, hidden), dtype=jnp.float32)
    xk_in = jax.random.normal(k_k, (batch, seq, hidden), dtype=jnp.float32)
    xv_in = jax.random.normal(k_v, (batch, seq, hidden), dtype=jnp.float32)

    mha = MultiHeadAttention(hidden, head_num=heads, dropout=0.1, param_key=k_par)

    # 1) Unmasked self-attention (shared-x single-matmul path).
    out = mha(x, x, x)
    jax.block_until_ready(out)

    # 2) Key-padding mask: last half of batch element 1 is masked out.
    mask = jnp.ones((batch, seq), jnp.int32).at[1, seq // 2:].set(0)
    out_masked = mha(x, x, x, mask=mask)
    jax.block_until_ready(out_masked)

    # 3) Distinct q / k / v inputs (general three-matmul path).
    out_cross = mha(x, xk_in, xv_in)
    jax.block_until_ready(out_cross)

    ref = reference_mha(mha, x, x, x)
    ref_masked = reference_mha(mha, x, x, x, mask=mask)
    ref_cross = reference_mha(mha, x, xk_in, xv_in)

    assert out.shape == (batch, seq, hidden)
    assert out_masked.shape == (batch, seq, hidden)
    assert out_cross.shape == (batch, seq, hidden)
    assert jnp.allclose(out, ref, atol=1e-2, rtol=1e-2), \
        float(jnp.max(jnp.abs(out - ref)))
    assert jnp.allclose(out_masked, ref_masked, atol=1e-2, rtol=1e-2), \
        float(jnp.max(jnp.abs(out_masked - ref_masked)))
    assert jnp.allclose(out_cross, ref_cross, atol=1e-2, rtol=1e-2), \
        float(jnp.max(jnp.abs(out_cross - ref_cross)))

    print("KERNEL_OK")
</pallas_src>

<mosaic_0001>
module attributes {stable_mosaic.version = 11 : i64} {
  func.func @_fused_mha_kernel(%arg0: i32, %arg1: memref<1x16x128xf32, #tpu.memory_space<vmem>>, %arg2: memref<128x384xf32, #tpu.memory_space<vmem>>, %arg3: memref<1x384xf32, #tpu.memory_space<vmem>>, %arg4: memref<1x16x128xf32, #tpu.memory_space<vmem>>) attributes {dimension_semantics = [#tpu.dimension_semantics<parallel>], iteration_bounds = array<i64: 2>, scalar_prefetch = 0 : i64, scratch_operands = 0 : i64, tpu.core_type = #tpu.core_type<tc>, window_params = [{transform_indices = @transform_0, window_bounds = array<i64: 1, 16, 128>}, {pipeline_mode = #tpu.pipeline_mode<synchronous>, transform_indices = @transform_1, window_bounds = array<i64: 128, 384>}, {pipeline_mode = #tpu.pipeline_mode<synchronous>, transform_indices = @transform_2, window_bounds = array<i64: 1, 384>}, {transform_indices = @transform_3, window_bounds = array<i64: 1, 16, 128>}]} {
    %c0 = arith.constant 0 : index
    %c0_0 = arith.constant 0 : index
    %0 = vector.load %arg2[%c0, %c0_0] : memref<128x384xf32, #tpu.memory_space<vmem>>, vector<128x384xf32>
    %c0_1 = arith.constant 0 : index
    %c0_2 = arith.constant 0 : index
    %1 = vector.load %arg3[%c0_1, %c0_2] : memref<1x384xf32, #tpu.memory_space<vmem>>, vector<1x384xf32>
    %c0_3 = arith.constant 0 : index
    %c0_4 = arith.constant 0 : index
    %c0_5 = arith.constant 0 : index
    %2 = vector.load %arg1[%c0_3, %c0_4, %c0_5] : memref<1x16x128xf32, #tpu.memory_space<vmem>>, vector<1x16x128xf32>
    %3 = vector.shape_cast %2 : vector<1x16x128xf32> to vector<16x128xf32>
    %cst = arith.constant dense<0.000000e+00> : vector<16x384xf32>
    %4 = tpu.matmul %3, %0, %cst {dimension_numbers = #tpu.dot_dimension_numbers<[1], [0], [0], [1], [0, 0, 1, 1], [], []>} : vector<16x128xf32>, vector<128x384xf32>, vector<16x384xf32> -> vector<16x384xf32>
    %5 = vector.broadcast %1 : vector<1x384xf32> to vector<16x384xf32>
    %6 = arith.addf %4, %5 : vector<16x384xf32>
    %7 = vector.extract_strided_slice %6 {offsets = [0, 0], sizes = [16, 128], strides = [1, 1]} : vector<16x384xf32> to vector<16x128xf32>
    %8 = vector.extract_strided_slice %6 {offsets = [0, 128], sizes = [16, 128], strides = [1, 1]} : vector<16x384xf32> to vector<16x128xf32>
    %9 = vector.extract_strided_slice %6 {offsets = [0, 256], sizes = [16, 128], strides = [1, 1]} : vector<16x384xf32> to vector<16x128xf32>
    %10 = vector.extract_strided_slice %7 {offsets = [0, 0], sizes = [16, 32], strides = [1, 1]} : vector<16x128xf32> to vector<16x32xf32>
    %11 = vector.extract_strided_slice %8 {offsets = [0, 0], sizes = [16, 32], strides = [1, 1]} : vector<16x128xf32> to vector<16x32xf32>
    %12 = vector.extract_strided_slice %9 {offsets = [0, 0], sizes = [16, 32], strides = [1, 1]} : vector<16x128xf32> to vector<16x32xf32>
    %cst_6 = arith.constant dense<0.000000e+00> : vector<16x16xf32>
    %13 = tpu.matmul %10, %11, %cst_6 {dimension_numbers = #tpu.dot_dimension_numbers<[1], [1], [0], [0], [0, 0, 1, 0], [], []>} : vector<16x32xf32>, vector<16x32xf32>, vector<16x16xf32> -> vector<16x16xf32>
    %cst_7 = arith.constant dense<0xFF800000> : vector<16xf32>
    %14 = vector.multi_reduction <maximumf>, %13, %cst_7 [1] : vector<16x16xf32> to vector<16xf32>
    %15 = vector.shape_cast %14 : vector<16xf32> to vector<16x1xf32>
    %16 = vector.broadcast %15 : vector<16x1xf32> to vector<16x16xf32>
    %17 = arith.subf %13, %16 : vector<16x16xf32>
    %18 = math.exp %17 : vector<16x16xf32>
    %cst_8 = arith.constant dense<0.000000e+00> : vector<16xf32>
    %19 = vector.multi_reduction <add>, %18, %cst_8 [1] : vector<16x16xf32> to vector<16xf32>
    %20 = vector.shape_cast %19 : vector<16xf32> to vector<16x1xf32>
    %cst_9 = arith.constant dense<0.000000e+00> : vector<16x32xf32>
    %21 = tpu.matmul %18, %12, %cst_9 {dimension_numbers = #tpu.dot_dimension_numbers<[1], [0], [0], [1], [0, 0, 1, 1], [], []>} : vector<16x16xf32>, vector<16x32xf32>, vector<16x32xf32> -> vector<16x32xf32>
    %22 = tpu.reciprocal %20 {approx = true} : vector<16x1xf32> -> vector<16x1xf32>
    %23 = vector.broadcast %22 : vector<16x1xf32> to vector<16x32xf32>
    %24 = arith.mulf %21, %23 : vector<16x32xf32>
    %25 = vector.extract_strided_slice %7 {offsets = [0, 32], sizes = [16, 32], strides = [1, 1]} : vector<16x128xf32> to vector<16x32xf32>
    %26 = vector.extract_strided_slice %8 {offsets = [0, 32], sizes = [16, 32], strides = [1, 1]} : vector<16x128xf32> to vector<16x32xf32>
    %27 = vector.extract_strided_slice %9 {offsets = [0, 32], sizes = [16, 32], strides = [1, 1]} : vector<16x128xf32> to vector<16x32xf32>
    %cst_10 = arith.constant dense<0.000000e+00> : vector<16x16xf32>
    %28 = tpu.matmul %25, %26, %cst_10 {dimension_numbers = #tpu.dot_dimension_numbers<[1], [1], [0], [0], [0, 0, 1, 0], [], []>} : vector<16x32xf32>, vector<16x32xf32>, vector<16x16xf32> -> vector<16x16xf32>
    %cst_11 = arith.constant dense<0xFF800000> : vector<16xf32>
    %29 = vector.multi_reduction <maximumf>, %28, %cst_11 [1] : vector<16x16xf32> to vector<16xf32>
    %30 = vector.shape_cast %29 : vector<16xf32> to vector<16x1xf32>
    %31 = vector.broadcast %30 : vector<16x1xf32> to vector<16x16xf32>
    %32 = arith.subf %28, %31 : vector<16x16xf32>
    %33 = math.exp %32 : vector<16x16xf32>
    %cst_12 = arith.constant dense<0.000000e+00> : vector<16xf32>
    %34 = vector.multi_reduction <add>, %33, %cst_12 [1] : vector<16x16xf32> to vector<16xf32>
    %35 = vector.shape_cast %34 : vector<16xf32> to vector<16x1xf32>
    %cst_13 = arith.constant dense<0.000000e+00> : vector<16x32xf32>
    %36 = tpu.matmul %33, %27, %cst_13 {dimension_numbers = #tpu.dot_dimension_numbers<[1], [0], [0], [1], [0, 0, 1, 1], [], []>} : vector<16x16xf32>, vector<16x32xf32>, vector<16x32xf32> -> vector<16x32xf32>
    %37 = tpu.reciprocal %35 {approx = true} : vector<16x1xf32> -> vector<16x1xf32>
    %38 = vector.broadcast %37 : vector<16x1xf32> to vector<16x32xf32>
    %39 = arith.mulf %36, %38 : vector<16x32xf32>
    %40 = vector.extract_strided_slice %7 {offsets = [0, 64], sizes = [16, 32], strides = [1, 1]} : vector<16x128xf32> to vector<16x32xf32>
    %41 = vector.extract_strided_slice %8 {offsets = [0, 64], sizes = [16, 32], strides = [1, 1]} : vector<16x128xf32> to vector<16x32xf32>
    %42 = vector.extract_strided_slice %9 {offsets = [0, 64], sizes = [16, 32], strides = [1, 1]} : vector<16x128xf32> to vector<16x32xf32>
    %cst_14 = arith.constant dense<0.000000e+00> : vector<16x16xf32>
    %43 = tpu.matmul %40, %41, %cst_14 {dimension_numbers = #tpu.dot_dimension_numbers<[1], [1], [0], [0], [0, 0, 1, 0], [], []>} : vector<16x32xf32>, vector<16x32xf32>, vector<16x16xf32> -> vector<16x16xf32>
    %cst_15 = arith.constant dense<0xFF800000> : vector<16xf32>
    %44 = vector.multi_reduction <maximumf>, %43, %cst_15 [1] : vector<16x16xf32> to vector<16xf32>
    %45 = vector.shape_cast %44 : vector<16xf32> to vector<16x1xf32>
    %46 = vector.broadcast %45 : vector<16x1xf32> to vector<16x16xf32>
    %47 = arith.subf %43, %46 : vector<16x16xf32>
    %48 = math.exp %47 : vector<16x16xf32>
    %cst_16 = arith.constant dense<0.000000e+00> : vector<16xf32>
    %49 = vector.multi_reduction <add>, %48, %cst_16 [1] : vector<16x16xf32> to vector<16xf32>
    %50 = vector.shape_cast %49 : vector<16xf32> to vector<16x1xf32>
    %cst_17 = arith.constant dense<0.000000e+00> : vector<16x32xf32>
    %51 = tpu.matmul %48, %42, %cst_17 {dimension_numbers = #tpu.dot_dimension_numbers<[1], [0], [0], [1], [0, 0, 1, 1], [], []>} : vector<16x16xf32>, vector<16x32xf32>, vector<16x32xf32> -> vector<16x32xf32>
    %52 = tpu.reciprocal %50 {approx = true} : vector<16x1xf32> -> vector<16x1xf32>
    %53 = vector.broadcast %52 : vector<16x1xf32> to vector<16x32xf32>
    %54 = arith.mulf %51, %53 : vector<16x32xf32>
    %55 = vector.extract_strided_slice %7 {offsets = [0, 96], sizes = [16, 32], strides = [1, 1]} : vector<16x128xf32> to vector<16x32xf32>
    %56 = vector.extract_strided_slice %8 {offsets = [0, 96], sizes = [16, 32], strides = [1, 1]} : vector<16x128xf32> to vector<16x32xf32>
    %57 = vector.extract_strided_slice %9 {offsets = [0, 96], sizes = [16, 32], strides = [1, 1]} : vector<16x128xf32> to vector<16x32xf32>
    %cst_18 = arith.constant dense<0.000000e+00> : vector<16x16xf32>
    %58 = tpu.matmul %55, %56, %cst_18 {dimension_numbers = #tpu.dot_dimension_numbers<[1], [1], [0], [0], [0, 0, 1, 0], [], []>} : vector<16x32xf32>, vector<16x32xf32>, vector<16x16xf32> -> vector<16x16xf32>
    %cst_19 = arith.constant dense<0xFF800000> : vector<16xf32>
    %59 = vector.multi_reduction <maximumf>, %58, %cst_19 [1] : vector<16x16xf32> to vector<16xf32>
    %60 = vector.shape_cast %59 : vector<16xf32> to vector<16x1xf32>
    %61 = vector.broadcast %60 : vector<16x1xf32> to vector<16x16xf32>
    %62 = arith.subf %58, %61 : vector<16x16xf32>
    %63 = math.exp %62 : vector<16x16xf32>
    %cst_20 = arith.constant dense<0.000000e+00> : vector<16xf32>
    %64 = vector.multi_reduction <add>, %63, %cst_20 [1] : vector<16x16xf32> to vector<16xf32>
    %65 = vector.shape_cast %64 : vector<16xf32> to vector<16x1xf32>
    %cst_21 = arith.constant dense<0.000000e+00> : vector<16x32xf32>
    %66 = tpu.matmul %63, %57, %cst_21 {dimension_numbers = #tpu.dot_dimension_numbers<[1], [0], [0], [1], [0, 0, 1, 1], [], []>} : vector<16x16xf32>, vector<16x32xf32>, vector<16x32xf32> -> vector<16x32xf32>
    %67 = tpu.reciprocal %65 {approx = true} : vector<16x1xf32> -> vector<16x1xf32>
    %68 = vector.broadcast %67 : vector<16x1xf32> to vector<16x32xf32>
    %69 = arith.mulf %66, %68 : vector<16x32xf32>
    %70 = tpu.concatenate %24, %39, %54, %69 in 1 : vector<16x32xf32>, vector<16x32xf32>, vector<16x32xf32>, vector<16x32xf32> -> vector<16x128xf32>
    %c0_22 = arith.constant 0 : index
    %c0_23 = arith.constant 0 : index
    %c0_24 = arith.constant 0 : index
    %71 = vector.load %arg4[%c0_22, %c0_23, %c0_24] : memref<1x16x128xf32, #tpu.memory_space<vmem>>, vector<1x16x128xf32>
    %72 = vector.shape_cast %71 : vector<1x16x128xf32> to vector<16x128xf32>
    %73 = vector.shape_cast %70 : vector<16x128xf32> to vector<1x16x128xf32>
    tpu.vector_store %arg4[%c0_22, %c0_23, %c0_24], %73 {strides = array<i32>} : memref<1x16x128xf32, #tpu.memory_space<vmem>>, vector<1x16x128xf32>,
    return
  }
  func.func @transform_0(%arg0: i32) -> (i32, i32, i32) {
    %c0_i32 = arith.constant 0 : i32
    %c0_i32_0 = arith.constant 0 : i32
    %c0_i32_1 = arith.constant 0 : i32
    return %arg0, %c0_i32, %c0_i32_0 : i32, i32, i32
  }
  func.func @transform_1(%arg0: i32) -> (i32, i32) {
    %c0_i32 = arith.constant 0 : i32
    %c0_i32_0 = arith.constant 0 : i32
    %c0_i32_1 = arith.constant 0 : i32
    return %c0_i32, %c0_i32_0 : i32, i32
  }
  func.func @transform_2(%arg0: i32) -> (i32, i32) {
    %c0_i32 = arith.constant 0 : i32
    %c0_i32_0 = arith.constant 0 : i32
    %c0_i32_1 = arith.constant 0 : i32
    return %c0_i32, %c0_i32_0 : i32, i32
  }
  func.func @transform_3(%arg0: i32) -> (i32, i32, i32) {
    %c0_i32 = arith.constant 0 : i32
    %c0_i32_0 = arith.constant 0 : i32
    %c0_i32_1 = arith.constant 0 : i32
    return %arg0, %c0_i32, %c0_i32_0 : i32, i32, i32
  }
}

</mosaic_0001>

<bundles_post_ra>
// kernel: tpu_custom_call.1
= control target key start
LH: loop header
LB: loop body
LE: loop exit
PB: predicated region body
PF: predicated region fallthrough
CT: control target
= control target key end

     0   :  { %8 = vsyncpa [#allocation3], 0  ;;  %s2261_s0 = inlined_call_operand.hbm [shape: f32[2,16,128], index: 0, kind: input, shape index: {}]   ;;  %s2262_s1 = inlined_call_operand.hbm [shape: f32[128,384], index: 1, kind: input, shape index: {}]   ;;  %s2263_s2 = inlined_call_operand.vmem [shape: f32[1,384], index: 2, kind: input, shape index: {}]   ;;  %s2264_s3 = inlined_call_operand.hbm [shape: f32[2,16,128], index: 3, kind: output, shape index: {}]  }
   0x1   :  { %10 = vsyncpa [#allocation3 + $0x1], 0 }
   0x2   :  { %11 = vsyncpa [#allocation6], 0 }
   0x3   :  { %12 = vsyncpa [#allocation4], 0 }
   0x4   :  { %14 = vsyncpa [#allocation4 + $0x1], 0  ;;  %s1927_s12 = smov 0   ;;  %s1929_s13 = smov 0  }
   0x5   :  { %s1931_s14 = smov 0   ;;  %s1933_s15 = smov 0  }
   0x6 LB: > { %s1948_s16 = sadd.s32 4294967295, %s1892_s15   ;;  %s1348_s17 = sadd.s32 4294967294, %s1892_s15   ;;  %s1892_s15 = sphi %s1933_s15, %s2286_s15   ;;  %s1888_s14 = sphi %s1931_s14, %s2285_s14   ;;  %s1884_s13 = sphi %s1929_s13, %s2284_s13   ;;  %s1880_s12 = sphi %s1927_s12, %s2283_s12  }
   0x7   : > { %p40_p0 = scmp.ne.s32.totalorder %s1884_s13, %s1880_s12  ;;  %p2265_p1 = scmp.eq.s32.totalorder %s1948_s16, 0 }
   0x8   : > { %p112_p3 = scmp.eq.s32.totalorder %s1348_s17, 1  ;;  %p1349_p5 = scmp.ge.s32.totalorder %s1892_s15, 1 }
   0x9   : > { %p1957_p4 = por %p2265_p1, %p40_p0  ;;  %p119_p7 = scmp.lt.s32.totalorder %s1892_s15, 3 }
   0xa   : > { %p1962_p6 = por %p112_p3, %p40_p0  ;;  %s1894_s21 = smov [#allocation5]  }
   0xb   : > { %s2268_s18 = scalar_select %p1957_p4, 1, 0 }
   0xc   : > { %s2269_s19 = scalar_select %p1962_p6, 1, 0 }
   0xd   : > { %p1967_p8 = pnand %p1349_p5, %p119_p7  ;;  %s131_s22 = sshll.u32 %s1894_s21, 4  ;;  %s1971_s22 = int_to_ptr.vmem [resolvable:$true] %s131_s22 }
   0xe   : > { %s1983_s24 = sadd.s32 1, %s1892_s15   ;;  %s27_s25 = sadd.s32 1, %s1888_s14 }
   0xf   : > { %s2270_s20 = scalar_select %p1967_p8, 1, 0 }
  0x10   : > { %p1643_p9 = pneg %p1967_p8  ;;  %s24_s26 = ssub.s32 %s1892_s15, %s1983_s24 }
  0x11   : > { %s1764_s29 = scalar_lea.hbm %s2262_s1, 6144 }
  0x12   : > { %p1978_p11 = pnand %p1643_p9, %p2265_p1  ;;  %p1765_p12 = scmp.ne.s32.totalorder %s2262_s1, %s1764_s29 }
  0x13   : > { %p1771_p5 = scmp.lt.u32.totalorder %s1764_s29, %s2262_s1 }
  0x14   : > { %p1766_p13 = pneg %p1978_p11 }
  0x16   : > { %p1767_p0 = pnand %p1766_p13, %p1765_p12 }
  0x18   : > { %p1768_p3 = pneg %p1767_p0 }
  0x1a   : > { %p1773_p7 = pnand %p1771_p5, %p1768_p3 }
  0x1c   : > { %1776 = shalt.err (!%p1773_p7)
}
  0x1d   : > { %s1777_s7 = scalar_lea.vmem %s1971_s22, 6144  ;;  %p1785_p2 = scmp.lt.s32.totalorder %s1971_s22, %s1971_s22 }
  0x1e   : > { %p1778_p9 = scmp.ne.s32.totalorder %s1971_s22, %s1777_s7  ;;  %p1786_p6 = scmp.lt.s32.totalorder %s1777_s7, %s1777_s7 }
  0x20   : > { %p1780_p10 = pnand %p1778_p9, %p1766_p13  ;;  %p1787_p4 = por %p1786_p6, %p1785_p2 }
  0x22   : > { %p1781_p1 = pneg %p1780_p10 }
  0x24   : > { %p1788_p8 = pnand %p1787_p4, %p1781_p1 }
  0x26   : > { %1791 = shalt.err (!%p1788_p8)
}
  0x27   : > { %s1895_s8 = smov 384   ;;  %s1896_s9 = smov 24  }
  0x28   : > { %1646 = dma.hbm_to_vmem [thread:$0]  (!%p1978_p11), %s2262_s1, 6144, %s1971_s22, [#allocation6], %s1895_s8, %s1895_s8, %s1896_s9  }
  0x29   : > { %p25_p2 = scmp.eq.s32.totalorder %s24_s26, 0  ;;  %p34_p1 = scmp.ne.s32.totalorder %s1888_s14, %s1884_s13 }
  0x2a   : > { %p35_p4 = scmp.eq.s32.totalorder %s1892_s15, 0  ;;  %p1656_p6 = scmp.lt.s32.totalorder %s1892_s15, 2 }
  0x2b   : > { %s2014_s17 = scalar_select %p25_p2, %s1888_s14, %s27_s25  }
  0x2c   : > { %p36_p8 = por %p35_p4, %p34_p1  ;;  %p2272_p10 = scmp.eq.s32.totalorder %s1948_s16, 1 }
  0x2d   : > { %s148_s27 = sand.u32 1, %s1888_s14   ;;  %s1388_s28 = sshll.u32 %s1892_s15, 8 }
  0x2e   : > { %p2018_p12 = por %p2272_p10, %p34_p1  ;;  %s1352_s29 = sshll.u32 %s148_s27, 4 }
  0x2f   : > { %s2027_s4 = scalar_lea.hbm %s2261_s0, %s1388_s28  ;;  %s152_s22 = scalar_lea.vmem [#allocation2], %s1352_s29 }
  0x30   : > { %s159_s25 = sshll.u32 %s152_s22, 4  ;;  %p2029_p11 = pnand %p1656_p6, %p36_p8  ;;  %s2033_s25 = int_to_ptr.vmem [resolvable:$true] %s159_s25 }
  0x31   : > { %s2035_s5 = scalar_lea.sflag [#allocation3], %s148_s27  ;;  %s1792_s6 = scalar_lea.hbm %s2027_s4, 256 }
  0x32   : > { %p1793_p13 = scmp.ne.s32.totalorder %s2027_s4, %s1792_s6  ;;  %p1794_p0 = pneg %p2029_p11 }
  0x33   : > { %s1797_s9 = scalar_lea.hbm %s2261_s0, 512  ;;  %p1798_p7 = scmp.lt.u32.totalorder %s2027_s4, %s2261_s0 }
  0x34   : > { %p1795_p3 = pnand %p1794_p0, %p1793_p13  ;;  %p1799_p9 = scmp.lt.u32.totalorder %s1797_s9, %s1792_s6 }
  0x35   : > { %p1801_p1 = scmp.lt.u32.totalorder %s1792_s6, %s2027_s4 }
  0x36   : > { %p1796_p5 = pneg %p1795_p3  ;;  %p1800_p2 = por %p1799_p9, %p1798_p7 }
  0x38   : > { %p1802_p4 = por %p1801_p1, %p1800_p2 }
  0x3a   : > { %p1803_p6 = pnand %p1802_p4, %p1796_p5 }
  0x3c   : > { %1806 = shalt.err (!%p1803_p6)
}
  0x3d   : > { %s1807_s27 = scalar_lea.vmem %s2033_s25, 256  ;;  %s1897_s28 = smov [#allocation2]  }
  0x3e   : > { %p1808_p8 = scmp.ne.s32.totalorder %s2033_s25, %s1807_s27  ;;  %s1812_s29 = sshll.u32 %s1897_s28, 4  ;;  %s1813_s29 = int_to_ptr.vmem [resolvable:$false] %s1812_s29 }
  0x3f   : > { %s1814_s23 = scalar_lea.vmem %s1813_s29, 512  ;;  %p1815_p3 = scmp.lt.s32.totalorder %s2033_s25, %s1813_s29 }
  0x40   : > { %p1810_p10 = pnand %p1808_p8, %p1794_p0  ;;  %p1816_p7 = scmp.lt.s32.totalorder %s1814_s23, %s1807_s27 }
  0x42   : > { %p1811_p13 = pneg %p1810_p10  ;;  %p1817_p9 = por %p1816_p7, %p1815_p3 }
  0x44   : > { %p1818_p2 = pnand %p1817_p9, %p1811_p13 }
  0x46   : > { %1821 = shalt.err (!%p1818_p2)
}
  0x47   : > { %s1898_s30 = smov 128   ;;  %s1899_s22 = smov 8  }
  0x48   : > { %1650 = dma.hbm_to_vmem [thread:$0]  (!%p2029_p11), %s2027_s4, 256, %s2033_s25, %s2035_s5, %s1898_s30, %s1898_s30, %s1899_s22  }
  0x49   : > { %p2275_p0 = scmp.ne.s32.totalorder %s2270_s20, 0 }
  0x4a   : > { %s2066_s6 = sand.u32 (!%p2275_p0), 1, %s1884_s13   ;;  %p2276_p5 = scmp.ne.s32.totalorder (!%p2275_p0), %s2268_s18, 0 }
  0x4b   : > { %171 = sbr.rel (%p2275_p0) target bundleno = 2215 (0x8a7), region = 32  ;;  %s1356_s7 = sshll.u32 (!%p2275_p0), %s2066_s6, 4 }
  0x4c   : > { %s174_s8 = scalar_lea.sflag (!%p2275_p0), [#allocation3], %s2066_s6  ;;  %s2072_s9 = scalar_lea.vmem (!%p2275_p0), [#allocation2], %s1356_s7 }
  0x52   : > { %1867 = dma.done.wait (%p2276_p5), %s174_s8, 256  }
  0x53   : > { %1869 = vsyncadd (%p2276_p5), %s174_s8, 4294967040  ;;  %p2277_p11 = scmp.eq.s32.totalorder %s1948_s16, 0 }
  0x55   : > { %1871 = dma.done.wait (%p2277_p11), [#allocation6], 6144   ;;  %p2278_p1 = pmov %p2277_p11 }
  0x56   : > { %v1900_v0 = vmov 0.0   ;;  %v205_v1 = vld [vmem:[#allocation5 + $0x8] sm:$0xff]  ;;  %v208_v2 = vld [vmem:[#allocation5 + $0x20] sm:$0xff]  ;;  %v207_v5 = vld [vmem:[#allocation5 + $0x18] sm:$0xff]  ;;  %vm423_vm0 = vcmask 261120   ;;  %s1901_s4 = smov 96  }
  0x57   : > { %1873 = vsyncadd (%p2278_p1), [#allocation6], 4294961152  ;;  %335 = vmatprep.mubr.f32.mxu0 %v1900_v0  ;;  %v204_v3 = vld [vmem:[#allocation5] sm:$0xff]  ;;  %v1531_v4 = vpack.c.bf16 %v208_v2, %v205_v1  ;;  %v211_v6 = vld [vmem:[#allocation5 + $0x38] sm:$0xff]  ;;  %vm511_vm2 = vcmask 130048   ;;  %s1902_s25 = smov 64  }
  0x58   : > { %v214_v7 = vld [vmem:[#allocation5 + $0x50] sm:$0xff]  ;;  %v1533_v8 = vpack.c.bf16 %v207_v5, %v204_v3  ;;  %v213_v11 = vld [vmem:[#allocation5 + $0x48] sm:$0xff]  ;;  %v220_v13 = vld [vmem:[#allocation5 + $0x80] sm:$0xff]  ;;  %s1903_s26 = smov 32   ;;  %vm1243_vm3 = vcmask 523264   ;;  %vm1246_vm4 = vcmask 785408  }
  0x59   : > { %v1535_v9 = vpack.c.bf16 %v214_v7, %v211_v6  ;;  %v210_v10 = vld [vmem:[#allocation5 + $0x30] sm:$0xff]  ;;  %v217_v12 = vld [vmem:[#allocation5 + $0x68] sm:$0xff]  ;;  %1532 = vmatprep.subr.bf16.mxu0 %v1531_v4  ;;  %v216_v16 = vld [vmem:[#allocation5 + $0x60] sm:$0xff]  ;;  %s203_s5 = scalar_lea.vmem [#allocation7], %s1356_s7  ;;  %s1389_s11 = sshll.u32 %s1948_s16, 8 }
  0x5a   : > { %1534 = vmatpush1.bf16.msra.mxu0 %v1533_v8  ;;  %v1537_v14 = vpack.c.bf16 %v213_v11, %v210_v10  ;;  %v1539_v15 = vpack.c.bf16 %v220_v13, %v217_v12  ;;  %v219_v17 = vld [vmem:[#allocation5 + $0x78] sm:$0xff]  ;;  %v226_v19 = vld [vmem:[#allocation5 + $0xb0] sm:$0xff]  ;;  %v225_v23 = vld [vmem:[#allocation5 + $0xa8] sm:$0xff]  ;;  %v256_v12 = vlaneseq  ;;  %s1265_s10 = sshll.u32 %s203_s5, 4  ;;  %s2217_s29 = scalar_lea.hbm %s2264_s3, %s1389_s11  ;;  %s2212_s10 = int_to_ptr.vmem [resolvable:$true] %s1265_s10 }
  0x5b   : > { %1536 = vmatprep.subr.bf16.mxu0 %v1535_v9  ;;  %v223_v18 = vld [vmem:[#allocation5 + $0x98] sm:$0xff]  ;;  %v1541_v20 = vpack.c.bf16 %v219_v17, %v216_v16  ;;  %v222_v22 = vld [vmem:[#allocation5 + $0x90] sm:$0xff]  ;;  %v229_v24 = vld [vmem:[#allocation5 + $0xc8] sm:$0xff]  ;;  %s1252_s23 = scalar_lea.sflag [#allocation4], %s2066_s6  ;;  %s1822_s16 = scalar_lea.vmem %s2212_s10, 256 }
  0x5c   : > { %v1543_v21 = vpack.c.bf16 %v226_v19, %v223_v18  ;;  %v232_v25 = vld [vmem:[#allocation5 + $0xe0] sm:$0xff]  ;;  %v206_v27 = vld [vmem:[#allocation5 + $0x10] sm:$0xff]  ;;  %v209_v28 = vld [vmem:[#allocation5 + $0x28] sm:$0xff]  ;;  %v1545_v29 = vpack.c.bf16 %v225_v23, %v222_v22  ;;  %v257_v13 = vshrl.u32 %v256_v12, 7  ;;  %p1823_p4 = scmp.ne.s32.totalorder %s2212_s10, %s1822_s16  ;;  %s1904_s30 = smov [#allocation7]  }
  0x5d   : > { %v2084_v26 = vld [vmem:[%s2072_s9] sm:$0xff]  ;;  %v1563_v31 = vpack.c.bf16 %v209_v28, %v206_v27  ;;  %v215_v33 = vld [vmem:[#allocation5 + $0x58] sm:$0xff]  ;;  %v1547_v34 = vpack.c.bf16 %v232_v25, %v229_v24  ;;  %v221_v38 = vld [vmem:[#allocation5 + $0x88] sm:$0xff]  ;;  %s1826_s22 = sshll.u32 %s1904_s30, 4  ;;  %s1827_s22 = int_to_ptr.vmem [resolvable:$false] %s1826_s22 }
  0x5e   : > { %1538 = vmatpush1.bf16.msra.mxu0 %v1537_v14  ;;  %1472 = vmatprep.mubr.f32.mxu1 %v2084_v26  ;;  %v228_v30 = vld [vmem:[#allocation5 + $0xc0] sm:$0xff]  ;;  %v231_v35 = vld [vmem:[#allocation5 + $0xd8] sm:$0xff]  ;;  %v218_v37 = vld [vmem:[#allocation5 + $0x70] sm:$0xff]  ;;  %v258_v14 = vsub.s32 0, %v257_v13  ;;  %v262_v17 = vsub.s32 1, %v257_v13  ;;  %p1824_p6 = pnand %p1823_p4, %p2018_p12  ;;  %s1828_s7 = scalar_lea.vmem %s1827_s22, 512 }
  0x5f   : > { %1540 = vmatprep.subr.bf16.mxu0 %v1539_v15  ;;  %v212_v32 = vld [vmem:[#allocation5 + $0x40] sm:$0xff]  ;;  %v235_v39 = vld [vmem:[#allocation5 + $0xf8] sm:$0xff]  ;;  %v238_v40 = vld [vmem:[#allocation5 + $0x110] sm:$0xff]  ;;  %1564 = vmatprep.subr.bf16.mxu1 %v1563_v31  ;;  %v1549_v41 = vpack.c.bf16 %v231_v35, %v228_v30  ;;  %v1571_v43 = vpack.c.bf16 %v221_v38, %v218_v37  ;;  %p1829_p10 = scmp.lt.s32.totalorder %s2212_s10, %s1827_s22  ;;  %p1830_p13 = scmp.lt.s32.totalorder %s1828_s7, %s1822_s16 }
  0x60   : > { %v1567_v36 = vpack.c.bf16 %v215_v33, %v212_v32  ;;  %1566 = vmatpush3.bf16.msra.mxu1 %v1563_v31  ;;  %v234_v42 = vld [vmem:[#allocation5 + $0xf0] sm:$0xff]  ;;  %v1551_v44 = vpack.c.bf16 %v238_v40, %v235_v39  ;;  %v237_v45 = vld [vmem:[#allocation5 + $0x108] sm:$0xff]  ;;  %v224_v46 = vld [vmem:[#allocation5 + $0xa0] sm:$0xff]  ;;  %p1825_p8 = pneg %p1824_p6 }
  0x61   : > { %v227_v47 = vld [vmem:[#allocation5 + $0xb8] sm:$0xff]  ;;  %v241_v48 = vld [vmem:[#allocation5 + $0x128] sm:$0xff]  ;;  %v244_v49 = vld [vmem:[#allocation5 + $0x140] sm:$0xff]  ;;  %v1553_v50 = vpack.c.bf16 %v237_v45, %v234_v42  ;;  %p1831_p3 = por %p1830_p13, %p1829_p10 }
  0x62   : > { %1542 = vmatpush1.bf16.msra.mxu0 %v1541_v20  ;;  %1568 = vmatprep.subr.bf16.mxu1 %v1567_v36  ;;  %v240_v51 = vld [vmem:[#allocation5 + $0x120] sm:$0xff]  ;;  %v1575_v52 = vpack.c.bf16 %v227_v47, %v224_v46  ;;  %v1555_v53 = vpack.c.bf16 %v244_v49, %v241_v48  ;;  %v243_v54 = vld [vmem:[#allocation5 + $0x138] sm:$0xff]  ;;  %v230_v55 = vld [vmem:[#allocation5 + $0xd0] sm:$0xff] }
  0x63   : > { %1544 = vmatprep.subr.bf16.mxu0 %v1543_v21  ;;  %v233_v56 = vld [vmem:[#allocation5 + $0xe8] sm:$0xff]  ;;  %v247_v57 = vld [vmem:[#allocation5 + $0x158] sm:$0xff]  ;;  %v250_v58 = vld [vmem:[#allocation5 + $0x170] sm:$0xff]  ;;  %v1557_v59 = vpack.c.bf16 %v243_v54, %v240_v51  ;;  %v266_v21 = vsub.s32 2, %v257_v13  ;;  %p1832_p7 = pnand %p1831_p3, %p1825_p8 }
  0x64   : > { %1570 = vmatpush3.bf16.msra.mxu1 %v1567_v36  ;;  %v246_v60 = vld [vmem:[#allocation5 + $0x150] sm:$0xff]  ;;  %v1579_v61 = vpack.c.bf16 %v233_v56, %v230_v55  ;;  %v1559_v62 = vpack.c.bf16 %v250_v58, %v247_v57  ;;  %v249_v63 = vld [vmem:[#allocation5 + $0x168] sm:$0xff]  ;;  %v236_v1 = vld [vmem:[#allocation5 + $0x100] sm:$0xff] }
  0x65   : > { %1572 = vmatprep.subr.bf16.mxu1 %v1571_v43  ;;  %v239_v2 = vld [vmem:[#allocation5 + $0x118] sm:$0xff]  ;;  %v1561_v3 = vpack.c.bf16 %v249_v63, %v246_v60  ;;  %v242_v5 = vld [vmem:[#allocation5 + $0x130] sm:$0xff]  ;;  %v245_v6 = vld [vmem:[#allocation5 + $0x148] sm:$0xff] }
  0x66   : > { %1546 = vmatpush1.bf16.msra.mxu0 %v1545_v29  ;;  %v1583_v4 = vpack.c.bf16 %v239_v2, %v236_v1  ;;  %v1587_v7 = vpack.c.bf16 %v245_v6, %v242_v5  ;;  %v248_v8 = vld [vmem:[#allocation5 + $0x160] sm:$0xff]  ;;  %v251_v9 = vld [vmem:[#allocation5 + $0x178] sm:$0xff]  ;;  %vm2099_vm1 = vmpackc.low %vm423_vm0, %vm423_vm0 }
  0x67   : > { %1548 = vmatprep.subr.bf16.mxu0 %v1547_v34  ;;  %v254_v10 = vld [vmem:[%s2072_s9 + $0x8] sm:$0xff]  ;;  %v1591_v11 = vpack.c.bf16 %v251_v9, %v248_v8  ;;  %v252_v15 = vld [vmem:[%s2263_s2] sm:$0x7] }
  0x68   : > { %1574 = vmatpush3.bf16.msra.mxu1 %v1571_v43  ;;  %v259_v16 = vrot.slane %v252_v15, %v258_v14  ;;  %v263_v20 = vrot.slane %v252_v15, %v262_v17  ;;  %v267_v27 = vrot.slane %v252_v15, %v266_v21 }
  0x69   : > { %1576 = vmatprep.subr.bf16.mxu1 %v1575_v52 }
  0x6a   : > { %1550 = vmatpush1.bf16.msra.mxu0 %v1549_v41 }
  0x6b   : > { %1552 = vmatprep.subr.bf16.mxu0 %v1551_v44 }
  0x6c   : > { %1578 = vmatpush3.bf16.msra.mxu1 %v1575_v52 }
  0x6d   : > { %1580 = vmatprep.subr.bf16.mxu1 %v1579_v61 }
  0x6e   : > { %1554 = vmatpush1.bf16.msra.mxu0 %v1553_v50 }
  0x6f   : > { %1556 = vmatprep.subr.bf16.mxu0 %v1555_v53 }
  0x70   : > { %1582 = vmatpush3.bf16.msra.mxu1 %v1579_v61 }
  0x71   : > { %1584 = vmatprep.subr.bf16.mxu1 %v1583_v4 }
  0x72   : > { %1558 = vmatpush1.bf16.msra.mxu0 %v1557_v59 }
  0x73   : > { %1560 = vmatprep.subr.bf16.mxu0 %v1559_v62 }
  0x74   : > { %1586 = vmatpush3.bf16.msra.mxu1 %v1583_v4 }
  0x75   : > { %1588 = vmatprep.subr.bf16.mxu1 %v1587_v7 }
  0x76   : > { %1562 = vmatpush1.bf16.msra.mxu0 %v1561_v3 }
  0x78   : > { %1590 = vmatpush3.bf16.msra.mxu1 %v1587_v7 }
  0x79   : > { %336 = vmatmul.mubr.f32.vlgmr.msra.gmra.mrb[0].mxu0 %v2084_v26  ;;  %1592 = vmatprep.subr.bf16.mxu1 %v1591_v11 }
  0x7a   : > { %341 = vmatprep.mubr.f32.mxu0 %v1900_v0 }
  0x7c   : > { %1594 = vmatpush3.bf16.msra.mxu1 %v1591_v11 }
  0x7d   : > { %342 = vmatmul.mubr.f32.gmra.mrb[2].mxu0 %v254_v10 }
  0x7f   : > { %1473 = vmatmul.mubr.f32.vlgmr.msra.gmra.mrb[0].mxu1 %v254_v10 }
 0x14c   : > { %v337_v18 = vpop.f32.mrb[0].mxu0 }
 0x14d   : > { %v2093_v0 = vadd.f32 %v337_v18, %v259_v16  ;;  %v339_v19 = vpop.f32.mrb[1].mxu0 }
 0x14e   : > { %v340_v24 = vadd.f32 %v339_v19, %v263_v20 }
 0x14f   : > { %1479 = vmatprep.mubr.msk.f32.mxu0 %vm423_vm0, %v2093_v0 }
 0x150   : > { %v343_v22 = vpop.f32.mrb[2].mxu0 }
 0x151   : > { %v345_v23 = vpop.f32.mrb[3].mxu0  ;;  %v2113_v35 = vadd.f32 %v343_v22, %v259_v16 }
 0x152   : > { %v346_v25 = vadd.f32 %v345_v23, %v263_v20  ;;  %v1474_v30 = vpop.f32.mrb[0].mxu1 }
 0x153   : > { %v420_v31 = vadd.f32 %v1474_v30, %v267_v27  ;;  %v414_v32 = vpop.f32.mrb[1].mxu1 }
 0x154   : > { %v2103_v28 = vpack.i.bf16 %v346_v25, %v340_v24  ;;  %v1595_v29 = vpack.c.bf16 %v346_v25, %v340_v24  ;;  %v415_v33 = vadd.f32 %v414_v32, %v267_v27 }
 0x156   : > { %1703 = vrot.lane.b32.xlu1 %v2103_v28, %s1901_s4  ;;  %1597 = vmatprep.subr.msk.bf16.mxu0 %vm2099_vm1, %v1595_v29  ;;  %v1601_v34 = vpack.c.bf16 %v420_v31, %v415_v33  ;;  %v2121_v44 = vpack.i.bf16 %v420_v31, %v415_v33 }
 0x157   : > { %1600 = vmatpush3.bf16.xpose.msk.msra.mxu0 %vm2099_vm1, %v1595_v29 }
 0x158   : > { %1602 = vmatprep.subr.bf16.mxu1 %v1601_v34 }
 0x159   : > { %1604 = vmatpush3.bf16.msra.mxu1 %v1601_v34 }
 0x15a   : > { %615 = vrot.lane.b32.xlu1 %v2093_v0, %s1901_s4 }
 0x15e   : > { %1480 = vmatmul.mubr.msk.f32.vlgmr.msra.gmra.mrb[4].mxu0 %vm423_vm0, %v2113_v35  ;;  %1708 = vrot.lane.b32.xlu1 %v2121_v44, %s1901_s4 }
 0x1c8   : > { %v1704_v36 = vpop.permute.xlu1 %1703 }
 0x1c9   : > { %v1706_v37 = vunpack.i.h.bf16 %v1704_v36  ;;  %v1705_v38 = vunpack.i.l.bf16 %v1704_v36 }
 0x1cb   : > { %v1605_v39 = vpack.c.bf16 %v1706_v37, %v1705_v38 }
 0x1cc   : > { %v616_v45 = vpop.permute.xlu1 %615 }
 0x1cd   : > { %1607 = vmatprep.subr.msk.bf16.mxu1 %vm2099_vm1, %v1605_v39 }
 0x1d0   : > { %v1709_v46 = vpop.permute.xlu1 %1708 }
 0x1d1   : > { %v1711_v47 = vunpack.i.h.bf16 %v1709_v46  ;;  %v1710_v48 = vunpack.i.l.bf16 %v1709_v46 }
 0x1d3   : > { %v1611_v49 = vpack.c.bf16 %v1711_v47, %v1710_v48 }
 0x1d5   : > { %1612 = vmatprep.subr.bf16.mxu0 %v1611_v49 }
 0x1d6   : > { %1614 = vmatpush3.bf16.msra.mxu0 %v1611_v49 }
 0x231   : > { %v1481_v40 = vpop.f32.mrb[4].mxu0 }
 0x232   : > { %v502_v41 = vpop.f32.mrb[5].mxu0  ;;  %v515_v43 = vsel %vm511_vm2, %v1481_v40, -inf }
 0x233   : > { %v512_v42 = vsel %vm511_vm2, %v502_v41, -inf }
 0x234   : > { %513 = vmax.xlane.f32.xlu0 %v512_v42 }
 0x238   : > { %516 = vmax.xlane.f32.xlu0 %v515_v43 }
 0x24e   : > { %617 = vrot.lane.b32.xlu0 %v2113_v35, %s1901_s4 }
 0x2c1   : > { %v514_v50 = vpop.xlane.xlu0 %513 }
 0x2c2   : > { %v518_v51 = vsub.f32 %v502_v41, %v514_v50 }
 0x2c4   : > { %v520_v52 = vmul.f32 1.442695, %v518_v51 }
 0x2c5   : > { %v517_v53 = vpop.xlane.xlu0 %516 }
 0x2c6   : > { %1732 = vpow2.f32 %v520_v52  ;;  %v519_v54 = vsub.f32 %v1481_v40, %v517_v53 }
 0x2c8   : > { %v522_v55 = vmul.f32 1.442695, %v519_v54 }
 0x2c9   : > { %v618_v58 = vpop.permute.xlu0 %617 }
 0x2ca   : > { %1734 = vpow2.f32 %v522_v55 }
 0x2d0   : > { %v2127_v56 = vpop.eup %1732 }
 0x2d1   : > { %1486 = vmatprep.mubr.msk.f32.mxu1 %vm511_vm2, %v2127_v56 }
 0x2d4   : > { %v2131_v57 = vpop.eup %1734 }
 0x2d5   : > { %1487 = vmatmul.mubr.msk.f32.vlgmr.msra.gmra.mrb[2].mxu1 %vm511_vm2, %v2131_v57 }
 0x2d6   : > { %1610 = vmatpush3.bf16.xpose.msk.msra.mxu1 %vm2099_vm1, %v1605_v39  ;;  %1493 = vmatprep.mubr.msk.f32.mxu1 %vm423_vm0, %v616_v45 }
 0x2dd   : > { %1494 = vmatmul.mubr.msk.f32.vlgmr.msra.gmra.mrb[4].mxu1 %vm423_vm0, %v618_v58 }
 0x3a8   : > { %v2139_v59 = vpop.f32.mrb[2].mxu1 }
 0x3a9   : > { %v2141_v60 = vpop.f32.mrb[3].mxu1 }
 0x3b0   : > { %v1495_v61 = vpop.f32.mrb[4].mxu1 }
 0x3b1   : > { %v697_v62 = vpop.f32.mrb[5].mxu1  ;;  %v709_v63 = vsel %vm511_vm2, %v1495_v61, -inf }
 0x3b2   : > { %710 = vmax.xlane.f32.xlu0 %v709_v63  ;;  %v706_v1 = vsel %vm511_vm2, %v697_v62, -inf }
 0x3b3   : > { %707 = vmax.xlane.f32.xlu1 %v706_v1 }
 0x3c4   : > { %817 = vrot.lane.b32.xlu1 %v2093_v0, %s1902_s25 }
 0x3c8   : > { %1713 = vrot.lane.b32.xlu0 %v2103_v28, %s1902_s25  ;;  %819 = vrot.lane.b32.xlu1 %v2113_v35, %s1902_s25 }
 0x3cc   : > { %1718 = vrot.lane.b32.xlu1 %v2121_v44, %s1902_s25 }
 0x43f   : > { %v711_v2 = vpop.xlane.xlu0 %710 }
 0x440   : > { %v713_v3 = vsub.f32 %v1495_v61, %v711_v2  ;;  %v708_v4 = vpop.xlane.xlu1 %707 }
 0x441   : > { %v712_v5 = vsub.f32 %v697_v62, %v708_v4 }
 0x442   : > { %v716_v6 = vmul.f32 1.442695, %v713_v3 }
 0x443   : > { %v714_v7 = vmul.f32 1.442695, %v712_v5  ;;  %v1714_v8 = vpop.permute.xlu0 %1713 }
 0x444   : > { %v1716_v9 = vunpack.i.h.bf16 %v1714_v8  ;;  %v1715_v10 = vunpack.i.l.bf16 %v1714_v8  ;;  %v818_v11 = vpop.permute.xlu1 %817  ;;  %v527_v8 = vsel %vm511_vm2, %v2131_v57, 0.0 }
 0x445   : > { %1736 = vpow2.f32 %v714_v7  ;;  %v524_v7 = vsel %vm511_vm2, %v2127_v56, 0.0 }
 0x446   : > { %1738 = vpow2.f32 %v716_v6  ;;  %v1615_v12 = vpack.c.bf16 %v1716_v9, %v1715_v10 }
 0x448   : > { %1617 = vmatprep.subr.msk.bf16.mxu0 %vm2099_vm1, %v1615_v12  ;;  %v820_v13 = vpop.permute.xlu1 %819 }
 0x44c   : > { %v1719_v14 = vpop.permute.xlu1 %1718 }
 0x44d   : > { %v1721_v15 = vunpack.i.h.bf16 %v1719_v14  ;;  %v1720_v16 = vunpack.i.l.bf16 %v1719_v14 }
 0x44f   : > { %v1737_v17 = vpop.eup %1736  ;;  %v1621_v18 = vpack.c.bf16 %v1721_v15, %v1720_v16 }
 0x450   : > { %v1739_v19 = vpop.eup %1738  ;;  %1500 = vmatprep.mubr.msk.f32.mxu0 %vm511_vm2, %v1737_v17  ;;  %v718_v47 = vsel %vm511_vm2, %v1737_v17, 0.0 }
 0x451   : > { %1501 = vmatmul.mubr.msk.f32.vlgmr.msra.gmra.mrb[6].mxu0 %vm511_vm2, %v1739_v19  ;;  %1622 = vmatprep.subr.bf16.mxu1 %v1621_v18  ;;  %v721_v26 = vsel %vm511_vm2, %v1739_v19, 0.0 }
 0x452   : > { %1620 = vmatpush3.bf16.xpose.msk.msra.mxu0 %vm2099_vm1, %v1615_v12  ;;  %1507 = vmatprep.mubr.msk.f32.mxu0 %vm423_vm0, %v818_v11 }
 0x453   : > { %1624 = vmatpush3.bf16.msra.mxu1 %v1621_v18 }
 0x459   : > { %1508 = vmatmul.mubr.msk.f32.vlgmr.msra.gmra.mrb[8].mxu0 %vm423_vm0, %v820_v13 }
 0x524   : > { %v2161_v20 = vpop.f32.mrb[6].mxu0 }
 0x525   : > { %v2163_v21 = vpop.f32.mrb[7].mxu0 }
 0x52c   : > { %v1509_v22 = vpop.f32.mrb[8].mxu0 }
 0x52d   : > { %v899_v23 = vpop.f32.mrb[9].mxu0  ;;  %v911_v24 = vsel %vm511_vm2, %v1509_v22, -inf }
 0x52e   : > { %912 = vmax.xlane.f32.xlu0 %v911_v24  ;;  %v908_v25 = vsel %vm511_vm2, %v899_v23, -inf }
 0x52f   : > { %909 = vmax.xlane.f32.xlu1 %v908_v25 }
 0x540   : > { %1017 = vrot.lane.b32.xlu1 %v2093_v0, %s1903_s26 }
 0x544   : > { %1723 = vrot.lane.b32.xlu0 %v2103_v28, %s1903_s26  ;;  %1019 = vrot.lane.b32.xlu1 %v2113_v35, %s1903_s26 }
 0x5bb   : > { %v913_v27 = vpop.xlane.xlu0 %912 }
 0x5bc   : > { %v915_v29 = vsub.f32 %v1509_v22, %v913_v27  ;;  %v910_v30 = vpop.xlane.xlu1 %909 }
 0x5bd   : > { %v914_v31 = vsub.f32 %v899_v23, %v910_v30 }
 0x5be   : > { %v918_v32 = vmul.f32 1.442695, %v915_v29 }
 0x5bf   : > { %v916_v33 = vmul.f32 1.442695, %v914_v31  ;;  %v1724_v34 = vpop.permute.xlu0 %1723 }
 0x5c0   : > { %v1726_v36 = vunpack.i.h.bf16 %v1724_v34  ;;  %v1725_v37 = vunpack.i.l.bf16 %v1724_v34  ;;  %v1018_v35 = vpop.permute.xlu1 %1017 }
 0x5c1   : > { %1740 = vpow2.f32 %v916_v33 }
 0x5c2   : > { %1742 = vpow2.f32 %v918_v32  ;;  %v1625_v38 = vpack.c.bf16 %v1726_v36, %v1725_v37 }
 0x5c4   : > { %1627 = vmatprep.subr.msk.bf16.mxu1 %vm2099_vm1, %v1625_v38  ;;  %v1020_v39 = vpop.permute.xlu1 %1019 }
 0x5cb   : > { %v1741_v0 = vpop.eup %1740 }
 0x5cc   : > { %v1743_v28 = vpop.eup %1742  ;;  %1514 = vmatprep.mubr.msk.f32.mxu1 %vm511_vm2, %v1741_v0  ;;  %v920_v48 = vsel %vm511_vm2, %v1741_v0, 0.0 }
 0x5cd   : > { %1515 = vmatmul.mubr.msk.f32.vlgmr.msra.gmra.mrb[6].mxu1 %vm511_vm2, %v1743_v28  ;;  %v923_v49 = vsel %vm511_vm2, %v1743_v28, 0.0 }
 0x5ce   : > { %1630 = vmatpush3.bf16.xpose.msk.msra.mxu1 %vm2099_vm1, %v1625_v38  ;;  %1521 = vmatprep.mubr.msk.f32.mxu1 %vm423_vm0, %v1018_v35 }
 0x5d5   : > { %1522 = vmatmul.mubr.msk.f32.vlgmr.msra.gmra.mrb[8].mxu1 %vm423_vm0, %v1020_v39 }
 0x6a0   : > { %v1516_v40 = vpop.f32.mrb[6].mxu1 }
 0x6a1   : > { %v1004_v41 = vpop.f32.mrb[7].mxu1 }
 0x6a8   : > { %v1523_v42 = vpop.f32.mrb[8].mxu1 }
 0x6a9   : > { %v1099_v43 = vpop.f32.mrb[9].mxu1  ;;  %v1111_v45 = vsel %vm511_vm2, %v1523_v42, -inf }
 0x6aa   : > { %1112 = vmax.xlane.f32.xlu0 %v1111_v45  ;;  %v1108_v46 = vsel %vm511_vm2, %v1099_v43, -inf }
 0x6ab   : > { %1109 = vmax.xlane.f32.xlu1 %v1108_v46 }
 0x6ae   : > { %719 = vadd.xlane.f32.xlu0 %v718_v47 }
 0x6b2   : > { %722 = vadd.xlane.f32.xlu0 %v721_v26 }
 0x6b6   : > { %921 = vadd.xlane.f32.xlu0 %v920_v48 }
 0x6ba   : > { %924 = vadd.xlane.f32.xlu0 %v923_v49 }
 0x6bc   : > { %1728 = vrot.lane.b32.xlu1 %v2121_v44, %s1903_s26 }
 0x737   : > { %v1113_v50 = vpop.xlane.xlu0 %1112 }
 0x738   : > { %v1115_v51 = vsub.f32 %v1523_v42, %v1113_v50  ;;  %v1110_v52 = vpop.xlane.xlu1 %1109 }
 0x739   : > { %v1114_v53 = vsub.f32 %v1099_v43, %v1110_v52 }
 0x73a   : > { %v1118_v54 = vmul.f32 1.442695, %v1115_v51 }
 0x73b   : > { %v1116_v55 = vmul.f32 1.442695, %v1114_v53  ;;  %v720_v58 = vpop.xlane.xlu0 %719 }
 0x73c   : > { %1744 = vpow2.f32 %v1118_v54  ;;  %v1729_v61 = vpop.permute.xlu1 %1728 }
 0x73d   : > { %1746 = vpow2.f32 %v1116_v55  ;;  %v1731_v62 = vunpack.i.h.bf16 %v1729_v61  ;;  %v1730_v63 = vunpack.i.l.bf16 %v1729_v61 }
 0x73f   : > { %v1631_v1 = vpack.c.bf16 %v1731_v62, %v1730_v63  ;;  %v723_v2 = vpop.xlane.xlu0 %722 }
 0x741   : > { %1632 = vmatprep.subr.bf16.mxu0 %v1631_v1 }
 0x742   : > { %1634 = vmatpush3.bf16.msra.mxu0 %v1631_v1 }
 0x743   : > { %v922_v5 = vpop.xlane.xlu0 %921 }
 0x744   : > { %1748 = vrcp.f32 %v922_v5 }
 0x745   : > { %1750 = vrcp.f32 %v720_v58 }
 0x746   : > { %v1745_v3 = vpop.eup %1744  ;;  %1752 = vrcp.f32 %v723_v2 }
 0x747   : > { %v1747_v4 = vpop.eup %1746  ;;  %v1123_v44 = vsel %vm511_vm2, %v1745_v3, 0.0  ;;  %v925_v11 = vpop.xlane.xlu0 %924 }
 0x748   : > { %1124 = vadd.xlane.f32.xlu1 %v1123_v44  ;;  %1528 = vmatprep.mubr.msk.f32.mxu0 %vm511_vm2, %v1747_v4  ;;  %v1120_v6 = vsel %vm511_vm2, %v1747_v4, 0.0  ;;  %1754 = vrcp.f32 %v925_v11 }
 0x749   : > { %1121 = vadd.xlane.f32.xlu0 %v1120_v6  ;;  %1529 = vmatmul.mubr.msk.f32.vlgmr.msra.gmra.mrb[10].mxu0 %vm511_vm2, %v1745_v3 }
 0x74d   : > { %525 = vadd.xlane.f32.xlu0 %v524_v7 }
 0x74e   : > { %v1749_v9 = vpop.eup %1748 }
 0x74f   : > { %v1015_v10 = vmul.f32 %v1749_v9, %v1004_v41  ;;  %v1751_v12 = vpop.eup %1750 }
 0x750   : > { %v815_v13 = vmul.f32 %v1751_v12, %v2163_v21  ;;  %v1753_v14 = vpop.eup %1752 }
 0x751   : > { %528 = vadd.xlane.f32.xlu0 %v527_v8  ;;  %v816_v56 = vmul.f32 %v1753_v14, %v2161_v20 }
 0x752   : > { %v1755_v15 = vpop.eup %1754 }
 0x753   : > { %v1016_v57 = vmul.f32 %v1755_v15, %v1516_v40 }
 0x759   : > { %1227 = vrot.lane.b32.xlu1 %v1015_v10, %s1902_s25 }
 0x767   : > { %1219 = vrot.lane.b32.xlu0 %v815_v13, %s1903_s26 }
 0x76b   : > { %1221 = vrot.lane.b32.xlu0 %v816_v56, %s1903_s26 }
 0x76f   : > { %1229 = vrot.lane.b32.xlu0 %v1016_v57, %s1902_s25 }
 0x7d5   : > { %v1125_v17 = vpop.xlane.xlu1 %1124 }
 0x7d6   : > { %v1122_v16 = vpop.xlane.xlu0 %1121 }
 0x7d7   : > { %1756 = vrcp.f32 %v1122_v16 }
 0x7d8   : > { %1758 = vrcp.f32 %v1125_v17 }
 0x7d9   : > { %v1228_v37 = vpop.permute.xlu1 %1227 }
 0x7da   : > { %v526_v20 = vpop.xlane.xlu0 %525 }
 0x7db   : > { %1760 = vrcp.f32 %v526_v20 }
 0x7de   : > { %v529_v25 = vpop.xlane.xlu0 %528 }
 0x7df   : > { %1762 = vrcp.f32 %v529_v25 }
 0x7e1   : > { %v1757_v19 = vpop.eup %1756 }
 0x7e2   : > { %v1759_v21 = vpop.eup %1758  ;;  %v1220_v27 = vpop.permute.xlu0 %1219 }
 0x7e5   : > { %v1761_v29 = vpop.eup %1760 }
 0x7e6   : > { %v1222_v30 = vpop.permute.xlu0 %1221  ;;  %v613_v31 = vmul.f32 %v1761_v29, %v2141_v60 }
 0x7e8   : > { %v1241_v34 = vsel %vm423_vm0, %v613_v31, %v1220_v27 }
 0x7e9   : > { %v1763_v32 = vpop.eup %1762  ;;  %v1244_v38 = vsel %vm1243_vm3, %v1241_v34, %v1228_v37 }
 0x7ea   : > { %v1230_v33 = vpop.permute.xlu0 %1229  ;;  %v614_v36 = vmul.f32 %v1763_v32, %v2139_v59 }
 0x7ec   : > { %v1242_v28 = vsel %vm423_vm0, %v614_v36, %v1222_v30 }
 0x7ed   : > { %v1245_v59 = vsel %vm1243_vm3, %v1242_v28, %v1230_v33 }
 0x81c   : > { %v1530_v18 = vpop.f32.mrb[10].mxu0 }
 0x81d   : > { %v1204_v22 = vpop.f32.mrb[11].mxu0  ;;  %v1216_v24 = vmul.f32 %v1759_v21, %v1530_v18 }
 0x81e   : > { %v1215_v23 = vmul.f32 %v1757_v19, %v1204_v22 }
 0x820   : > { %1235 = vrot.lane.b32.xlu0 %v1215_v23, %s1901_s4 }
 0x824   : > { %1237 = vrot.lane.b32.xlu0 %v1216_v24, %s1901_s4 }
 0x892   : > { %v1236_v0 = vpop.permute.xlu0 %1235 }
 0x893   : > { %v1247_v60 = vsel %vm1246_vm4, %v1244_v38, %v1236_v0 }
 0x894   : > { %1249 = vst [vmem:[%s203_s5] sm:$0xff] %v1247_v60 }
 0x896   : > { %v1238_v35 = vpop.permute.xlu0 %1237 }
 0x897   : > { %v1248_v39 = vsel %vm1246_vm4, %v1245_v59, %v1238_v35 }
 0x898   : > { %1250 = vst [vmem:[%s203_s5 + $0x8] sm:$0xff] %v1248_v39 }
 0x899   : > { %1835 = shalt.err (!%p1832_p7)
}
 0x89a   : > { %s1836_s8 = scalar_lea.hbm %s2217_s29, 256  ;;  %s1840_s20 = scalar_lea.hbm %s2264_s3, 512 }
 0x89b   : > { %p1837_p9 = scmp.ne.s32.totalorder %s2217_s29, %s1836_s8  ;;  %p1841_p5 = scmp.lt.u32.totalorder %s2217_s29, %s2264_s3 }
 0x89c   : > { %p1842_p11 = scmp.lt.u32.totalorder %s1840_s20, %s1836_s8  ;;  %p1844_p4 = scmp.lt.u32.totalorder %s1836_s8, %s2217_s29 }
 0x89d   : > { %p1838_p2 = pnand %p1837_p9, %p2018_p12 }
 0x89e   : > { %p1843_p1 = por %p1842_p11, %p1841_p5 }
 0x89f   : > { %p1839_p0 = pneg %p1838_p2 }
 0x8a0   : > { %p1845_p6 = por %p1844_p4, %p1843_p1 }
 0x8a2   : > { %p1846_p8 = pnand %p1845_p6, %p1839_p0 }
 0x8a4   : > { %1849 = shalt.err (!%p1846_p8)
}
 0x8a5   : > { %s1905_s26 = smov 128   ;;  %s1906_s5 = smov 8  }
 0x8a6   : > { %1641 = dma.vmem_to_hbm [thread:$0]  (%p2018_p12), %s2212_s10, 256, %s2217_s29, %s1252_s23, %s1905_s26, %s1905_s26, %s1906_s5  }
 0x8a7 PF: > { %s1280_s11 = sand.u32 1, %s1880_s12   ;;  %p2281_p10 = scmp.ne.s32.totalorder %s2269_s19, 0 }
 0x8a8   : > { %p2282_p13 = scmp.ge.s32.totalorder %s1892_s15, 2  ;;  %s1281_s27 = scalar_lea.sflag [#allocation4], %s1280_s11 }
 0x8aa   : > { %p1652_p3 = pnand %p2282_p13, %p2281_p10 }
 0x8ac   : > { %1875 = dma.done.wait (!%p1652_p3), %s1281_s27, 256  }
 0x8ad   : > { %1877 = vsyncadd (!%p1652_p3), %s1281_s27, 4294967040  ;;  %p17_p7 = scmp.ge.s32.totalorder %s1983_s24, 4   ;;  %s2283_s12 = smov %s1884_s13 }
 0x8ae   : > { %s2284_s13 = smov %s1888_s14  ;;  %s2285_s14 = smov %s2014_s17 }
 0x8af   : > { %s2286_s15 = smov %s1983_s24  ;;  %19 = sbr.rel (!%p17_p7) target bundleno = 6 (0x6), region = 81 }
 0x8b6   :  { %1286 = vsyncpa [#allocation3], 1 }
 0x8b7   :  { %1288 = vsyncpa [#allocation3 + $0x1], 1 }
 0x8b8   :  { %1289 = vsyncpa [#allocation6], 1 }
 0x8b9   :  { %1290 = vsyncpa [#allocation4], 1 }
 0x8ba   :  { %1292 = vsyncpa [#allocation4 + $0x1], 1 }

</bundles_post_ra>
